<compile_context>
chip_gen: v7x
topology: tpu7x:2x2x1
jax: 0.10.0
libtpu: 0.0.40
codegen_flags: <defaults>
</compile_context>

<pallas_src>
import jax
import jax.numpy as jnp
from jax import lax
from jax.experimental import pallas as pl
from jax.experimental.pallas import tpu as pltpu


def _round_up(n, m):
    return ((n + m - 1) // m) * m


def mlp_kernel(x_ref,
               w0_ref, b0_ref,
               w1_ref, b1_ref,
               w2_ref, b2_ref,
               w3_ref, b3_ref,
               o_ref):
    """Batch-on-lanes fused MLP.

    x_ref : [bb, 16] f32   (natural layout; transpose happens via dot_general)
    w0    : [64, 16] f32   (layer 0 kept f32 for accuracy — K=16, ~free)
    w1,w2 : [64, 64] bf16  (PyTorch nn.Linear [out, in] orientation)
    w3    : [1, 64]  bf16
    bN    : [64, 1]  f32   (column bias, broadcasts across the lane axis)
    b3    : [1, 1]   f32   scalar in SMEM
    o_ref : [1, bb]  f32   lane-dense output row
    """
    # layer_0 (16 -> 64) + ReLU, f32 MXU pass; contract w0 dim 1 with x dim 1,
    # which puts batch on the lane axis without an explicit transpose.
    h = lax.dot_general(w0_ref[...], x_ref[...],
                        dimension_numbers=(((1,), (1,)), ((), ())),
                        preferred_element_type=jnp.float32)          # [64, bb]
    h = jnp.maximum(h + b0_ref[...], 0.0).astype(jnp.bfloat16)
    # layer_1 (64 -> 64) + ReLU  (bf16 operands, f32 accumulate)
    h = jnp.dot(w1_ref[...], h, preferred_element_type=jnp.float32)
    h = jnp.maximum(h + b1_ref[...], 0.0).astype(jnp.bfloat16)
    # layer_2 (64 -> 64) + ReLU
    h = jnp.dot(w2_ref[...], h, preferred_element_type=jnp.float32)
    h = jnp.maximum(h + b2_ref[...], 0.0).astype(jnp.bfloat16)
    # layer_end (64 -> 1): [1,64] @ [64,bb] -> [1, bb]  (lane-dense result row)
    y = jnp.dot(w3_ref[...], h, preferred_element_type=jnp.float32)
    o_ref[...] = (y + b3_ref[0, 0]).astype(o_ref.dtype)


def _choose_tile(B, block_b, min_steps=2):
    """Pick a batch tile: multiple of 128, big enough to amortize grid-step
    overhead, small enough that the parallel grid has >= min_steps steps
    (so both TensorCores on v7x get work)."""
    Bp0 = _round_up(B, 128)
    bb = min(_round_up(block_b, 128), Bp0)
    if Bp0 > 128:
        bb = min(bb, max(128, _round_up(pl.cdiv(Bp0, min_steps), 128)))
    Bp = _round_up(B, bb)
    return bb, Bp


def mlp_forward(x, params, *, block_b=4096):
    """Fused MLP forward.  x: [B, 16] f32 -> [B, 1] f32."""
    (w0, b0), (w1, b1), (w2, b2), (w3, b3) = params
    B = x.shape[0]

    bb, Bp = _choose_tile(B, block_b)
    grid = (Bp // bb,)

    # Wrapper-side plumbing: only the ragged-batch zero pad (safe: no
    # cross-batch op; padded columns are sliced off below).
    x_pad = x if Bp == B else jnp.pad(x, ((0, Bp - B), (0, 0)))
    x_pad = x_pad.astype(jnp.float32)

    w0f = w0.astype(jnp.float32)                                  # layer 0 f32
    w1b, w2b, w3b = (w.astype(jnp.bfloat16) for w in (w1, w2, w3))
    b0c = b0.reshape(-1, 1).astype(jnp.float32)                   # [64, 1]
    b1c = b1.reshape(-1, 1).astype(jnp.float32)
    b2c = b2.reshape(-1, 1).astype(jnp.float32)
    b3s = b3.reshape(1, 1).astype(jnp.float32)                    # [1, 1] SMEM

    def full_vmem(arr):
        shape = arr.shape
        return pl.BlockSpec(shape, lambda i, _s=shape: tuple(0 for _ in _s))

    weight_bytes = sum(int(a.size) * a.dtype.itemsize
                       for a in (w0f, b0c, w1b, b1c, w2b, b2c, w3b, b3s))
    cost = pl.CostEstimate(
        flops=2 * 9280 * Bp,                       # 16*64 + 64*64*2 + 64*1 MACs
        transcendentals=0,
        bytes_accessed=Bp * 16 * 4 + Bp * 4 + weight_bytes,
    )

    out = pl.pallas_call(
        mlp_kernel,
        out_shape=jax.ShapeDtypeStruct((1, Bp), jnp.float32),
        grid_spec=pltpu.PrefetchScalarGridSpec(
            num_scalar_prefetch=0,
            grid=grid,
            in_specs=[
                pl.BlockSpec((bb, 16), lambda i: (i, 0)),         # x tile
                full_vmem(w0f), full_vmem(b0c),
                full_vmem(w1b), full_vmem(b1c),
                full_vmem(w2b), full_vmem(b2c),
                full_vmem(w3b),
                pl.BlockSpec(memory_space=pltpu.MemorySpace.SMEM),  # b3 scalar
            ],
            out_specs=pl.BlockSpec((1, bb), lambda i: (0, i)),    # lane-dense
        ),
        compiler_params=pltpu.CompilerParams(
            dimension_semantics=("parallel",)),
        cost_estimate=cost,
    )(x_pad, w0f, b0c, w1b, b1c, w2b, b2c, w3b, b3s)

    # Drop padding, return in the module's [B, 1] shape.
    return out[0, :B].reshape(B, 1)


def init_params(key):
    """Deterministic init mimicking nn.Linear (uniform(-1/sqrt(fan_in), ...)).

    Weights kept in PyTorch [out, in] orientation, biases as [out]."""
    dims = [(16, 64), (64, 64), (64, 64), (64, 1)]
    params = []
    for fan_in, fan_out in dims:
        key, kw, kb = jax.random.split(key, 3)
        bound = 1.0 / jnp.sqrt(fan_in)
        w = jax.random.uniform(kw, (fan_out, fan_in), jnp.float32,
                               minval=-bound, maxval=bound)
        b = jax.random.uniform(kb, (fan_out,), jnp.float32,
                               minval=-bound, maxval=bound)
        params.append((w, b))
    return params


def reference_forward(x, params):
    """Pure f32 reference matching the PyTorch module semantics."""
    h = x
    for idx, (w, b) in enumerate(params):
        h = h @ w.T + b
        if idx < len(params) - 1:
            h = jnp.maximum(h, 0.0)
    return h


if __name__ == "__main__":
    key = jax.random.PRNGKey(0)
    kx, kx2, kp = jax.random.split(key, 3)
    params = init_params(kp)

    # Small batch (single grid step).
    batch = 8
    x = jax.random.normal(kx, (batch, 16), jnp.float32)
    out = jax.block_until_ready(mlp_forward(x, params))
    ref = reference_forward(x, params)
    assert out.shape == (batch, 1), out.shape
    # bf16 MXU inputs on layers 1-3 perturb low-order bits vs the f32 reference.
    assert jnp.allclose(out, ref, atol=3e-2, rtol=3e-2), \
        float(jnp.max(jnp.abs(out - ref)))

    # Ragged batch exercising padding + a multi-step (2-core-friendly) grid.
    batch2 = 300
    x2 = jax.random.normal(kx2, (batch2, 16), jnp.float32)
    out2 = jax.block_until_ready(mlp_forward(x2, params))
    ref2 = reference_forward(x2, params)
    assert out2.shape == (batch2, 1), out2.shape
    assert jnp.allclose(out2, ref2, atol=3e-2, rtol=3e-2), \
        float(jnp.max(jnp.abs(out2 - ref2)))

    print("KERNEL_OK")
</pallas_src>

<mosaic_0001>
module attributes {stable_mosaic.version = 11 : i64} {
  func.func @mlp_kernel(%arg0: i32, %arg1: memref<128x16xf32, #tpu.memory_space<vmem>>, %arg2: memref<64x16xf32, #tpu.memory_space<vmem>>, %arg3: memref<64x1xf32, #tpu.memory_space<vmem>>, %arg4: memref<64x64xbf16, #tpu.memory_space<vmem>>, %arg5: memref<64x1xf32, #tpu.memory_space<vmem>>, %arg6: memref<64x64xbf16, #tpu.memory_space<vmem>>, %arg7: memref<64x1xf32, #tpu.memory_space<vmem>>, %arg8: memref<1x64xbf16, #tpu.memory_space<vmem>>, %arg9: memref<1x1xf32, #tpu.memory_space<smem>>, %arg10: memref<1x128xf32, #tpu.memory_space<vmem>>) attributes {dimension_semantics = [#tpu.dimension_semantics<parallel>], iteration_bounds = array<i64: 1>, scalar_prefetch = 0 : i64, scratch_operands = 0 : i64, tpu.core_type = #tpu.core_type<tc>, window_params = [{transform_indices = @transform_0, window_bounds = array<i64: 128, 16>}, {pipeline_mode = #tpu.pipeline_mode<synchronous>, transform_indices = @transform_1, window_bounds = array<i64: 64, 16>}, {pipeline_mode = #tpu.pipeline_mode<synchronous>, transform_indices = @transform_2, window_bounds = array<i64: 64, 1>}, {pipeline_mode = #tpu.pipeline_mode<synchronous>, transform_indices = @transform_3, window_bounds = array<i64: 64, 64>}, {pipeline_mode = #tpu.pipeline_mode<synchronous>, transform_indices = @transform_4, window_bounds = array<i64: 64, 1>}, {pipeline_mode = #tpu.pipeline_mode<synchronous>, transform_indices = @transform_5, window_bounds = array<i64: 64, 64>}, {pipeline_mode = #tpu.pipeline_mode<synchronous>, transform_indices = @transform_6, window_bounds = array<i64: 64, 1>}, {pipeline_mode = #tpu.pipeline_mode<synchronous>, transform_indices = @transform_7, window_bounds = array<i64: 1, 64>}, {transform_indices = @transform_8, window_bounds = array<i64: 1, 1>}, {transform_indices = @transform_9, window_bounds = array<i64: 1, 128>}]} {
    %c0 = arith.constant 0 : index
    %c0_0 = arith.constant 0 : index
    %0 = vector.load %arg2[%c0, %c0_0] : memref<64x16xf32, #tpu.memory_space<vmem>>, vector<64x16xf32>
    %c0_1 = arith.constant 0 : index
    %c0_2 = arith.constant 0 : index
    %1 = vector.load %arg1[%c0_1, %c0_2] : memref<128x16xf32, #tpu.memory_space<vmem>>, vector<128x16xf32>
    %cst = arith.constant dense<0.000000e+00> : vector<64x128xf32>
    %2 = tpu.matmul %0, %1, %cst {dimension_numbers = #tpu.dot_dimension_numbers<[1], [1], [0], [0], [0, 0, 1, 0], [], []>} : vector<64x16xf32>, vector<128x16xf32>, vector<64x128xf32> -> vector<64x128xf32>
    %c0_3 = arith.constant 0 : index
    %c0_4 = arith.constant 0 : index
    %3 = vector.load %arg3[%c0_3, %c0_4] : memref<64x1xf32, #tpu.memory_space<vmem>>, vector<64x1xf32>
    %4 = vector.broadcast %3 : vector<64x1xf32> to vector<64x128xf32>
    %5 = arith.addf %2, %4 : vector<64x128xf32>
    %cst_5 = arith.constant 0.000000e+00 : f32
    %6 = vector.broadcast %cst_5 : f32 to vector<64x128xf32>
    %7 = arith.maximumf %5, %6 : vector<64x128xf32>
    %8 = arith.truncf %7 : vector<64x128xf32> to vector<64x128xbf16>
    %c0_6 = arith.constant 0 : index
    %c0_7 = arith.constant 0 : index
    %9 = vector.load %arg4[%c0_6, %c0_7] : memref<64x64xbf16, #tpu.memory_space<vmem>>, vector<64x64xbf16>
    %cst_8 = arith.constant dense<0.000000e+00> : vector<64x128xf32>
    %10 = tpu.matmul %9, %8, %cst_8 {dimension_numbers = #tpu.dot_dimension_numbers<[1], [0], [0], [1], [0, 0, 1, 1], [], []>} : vector<64x64xbf16>, vector<64x128xbf16>, vector<64x128xf32> -> vector<64x128xf32>
    %c0_9 = arith.constant 0 : index
    %c0_10 = arith.constant 0 : index
    %11 = vector.load %arg5[%c0_9, %c0_10] : memref<64x1xf32, #tpu.memory_space<vmem>>, vector<64x1xf32>
    %12 = vector.broadcast %11 : vector<64x1xf32> to vector<64x128xf32>
    %13 = arith.addf %10, %12 : vector<64x128xf32>
    %cst_11 = arith.constant 0.000000e+00 : f32
    %14 = vector.broadcast %cst_11 : f32 to vector<64x128xf32>
    %15 = arith.maximumf %13, %14 : vector<64x128xf32>
    %16 = arith.truncf %15 : vector<64x128xf32> to vector<64x128xbf16>
    %c0_12 = arith.constant 0 : index
    %c0_13 = arith.constant 0 : index
    %17 = vector.load %arg6[%c0_12, %c0_13] : memref<64x64xbf16, #tpu.memory_space<vmem>>, vector<64x64xbf16>
    %cst_14 = arith.constant dense<0.000000e+00> : vector<64x128xf32>
    %18 = tpu.matmul %17, %16, %cst_14 {dimension_numbers = #tpu.dot_dimension_numbers<[1], [0], [0], [1], [0, 0, 1, 1], [], []>} : vector<64x64xbf16>, vector<64x128xbf16>, vector<64x128xf32> -> vector<64x128xf32>
    %c0_15 = arith.constant 0 : index
    %c0_16 = arith.constant 0 : index
    %19 = vector.load %arg7[%c0_15, %c0_16] : memref<64x1xf32, #tpu.memory_space<vmem>>, vector<64x1xf32>
    %20 = vector.broadcast %19 : vector<64x1xf32> to vector<64x128xf32>
    %21 = arith.addf %18, %20 : vector<64x128xf32>
    %cst_17 = arith.constant 0.000000e+00 : f32
    %22 = vector.broadcast %cst_17 : f32 to vector<64x128xf32>
    %23 = arith.maximumf %21, %22 : vector<64x128xf32>
    %24 = arith.truncf %23 : vector<64x128xf32> to vector<64x128xbf16>
    %c0_18 = arith.constant 0 : index
    %c0_19 = arith.constant 0 : index
    %25 = vector.load %arg8[%c0_18, %c0_19] : memref<1x64xbf16, #tpu.memory_space<vmem>>, vector<1x64xbf16>
    %cst_20 = arith.constant dense<0.000000e+00> : vector<1x128xf32>
    %26 = tpu.matmul %25, %24, %cst_20 {dimension_numbers = #tpu.dot_dimension_numbers<[1], [0], [0], [1], [0, 0, 1, 1], [], []>} : vector<1x64xbf16>, vector<64x128xbf16>, vector<1x128xf32> -> vector<1x128xf32>
    %c0_21 = arith.constant 0 : index
    %c0_22 = arith.constant 0 : index
    %27 = memref.load %arg9[%c0_21, %c0_22] : memref<1x1xf32, #tpu.memory_space<smem>>
    %28 = vector.broadcast %27 : f32 to vector<1x128xf32>
    %29 = arith.addf %26, %28 : vector<1x128xf32>
    %c0_23 = arith.constant 0 : index
    %c0_24 = arith.constant 0 : index
    %30 = vector.load %arg10[%c0_23, %c0_24] : memref<1x128xf32, #tpu.memory_space<vmem>>, vector<1x128xf32>
    tpu.vector_store %arg10[%c0_23, %c0_24], %29 {strides = array<i32>} : memref<1x128xf32, #tpu.memory_space<vmem>>, vector<1x128xf32>,
    return
  }
  func.func @transform_0(%arg0: i32) -> (i32, i32) {
    %c0_i32 = arith.constant 0 : i32
    %c0_i32_0 = arith.constant 0 : i32
    return %arg0, %c0_i32 : i32, i32
  }
  func.func @transform_1(%arg0: i32) -> (i32, i32) {
    %c0_i32 = arith.constant 0 : i32
    %c0_i32_0 = arith.constant 0 : i32
    %c0_i32_1 = arith.constant 0 : i32
    return %c0_i32, %c0_i32_0 : i32, i32
  }
  func.func @transform_2(%arg0: i32) -> (i32, i32) {
    %c0_i32 = arith.constant 0 : i32
    %c0_i32_0 = arith.constant 0 : i32
    %c0_i32_1 = arith.constant 0 : i32
    return %c0_i32, %c0_i32_0 : i32, i32
  }
  func.func @transform_3(%arg0: i32) -> (i32, i32) {
    %c0_i32 = arith.constant 0 : i32
    %c0_i32_0 = arith.constant 0 : i32
    %c0_i32_1 = arith.constant 0 : i32
    return %c0_i32, %c0_i32_0 : i32, i32
  }
  func.func @transform_4(%arg0: i32) -> (i32, i32) {
    %c0_i32 = arith.constant 0 : i32
    %c0_i32_0 = arith.constant 0 : i32
    %c0_i32_1 = arith.constant 0 : i32
    return %c0_i32, %c0_i32_0 : i32, i32
  }
  func.func @transform_5(%arg0: i32) -> (i32, i32) {
    %c0_i32 = arith.constant 0 : i32
    %c0_i32_0 = arith.constant 0 : i32
    %c0_i32_1 = arith.constant 0 : i32
    return %c0_i32, %c0_i32_0 : i32, i32
  }
  func.func @transform_6(%arg0: i32) -> (i32, i32) {
    %c0_i32 = arith.constant 0 : i32
    %c0_i32_0 = arith.constant 0 : i32
    %c0_i32_1 = arith.constant 0 : i32
    return %c0_i32, %c0_i32_0 : i32, i32
  }
  func.func @transform_7(%arg0: i32) -> (i32, i32) {
    %c0_i32 = arith.constant 0 : i32
    %c0_i32_0 = arith.constant 0 : i32
    %c0_i32_1 = arith.constant 0 : i32
    return %c0_i32, %c0_i32_0 : i32, i32
  }
  func.func @transform_8(%arg0: i32) -> (i32, i32) {
    %c0_i32 = arith.constant 0 : i32
    %c0_i32_0 = arith.constant 0 : i32
    %c0_i32_1 = arith.constant 0 : i32
    return %c0_i32, %c0_i32_0 : i32, i32
  }
  func.func @transform_9(%arg0: i32) -> (i32, i32) {
    %c0_i32 = arith.constant 0 : i32
    %c0_i32_0 = arith.constant 0 : i32
    return %c0_i32, %arg0 : i32, i32
  }
}

</mosaic_0001>

<bundles_post_ra>
// kernel: tpu_custom_call.1
= control target key start
LH: loop header
LB: loop body
LE: loop exit
PB: predicated region body
PF: predicated region fallthrough
CT: control target
= control target key end

     0   :  { %vm107_vm0 = vcmask 130048   ;;  %v949_v6 = vmov 0   ;;  %s1244_s0 = inlined_call_operand.vmem [shape: f32[128,16], index: 0, kind: input, shape index: {}]   ;;  %s1245_s1 = inlined_call_operand.vmem [shape: f32[64,16], index: 1, kind: input, shape index: {}]   ;;  %s1246_s2 = inlined_call_operand.vmem [shape: f32[64,1], index: 2, kind: input, shape index: {}]   ;;  %s1247_s3 = inlined_call_operand.vmem [shape: bf16[64,64], index: 3, kind: input, shape index: {}]   ;;  %s1248_s4 = inlined_call_operand.vmem [shape: f32[64,1], index: 4, kind: input, shape index: {}]   ;;  %s1249_s5 = inlined_call_operand.vmem [shape: bf16[64,64], index: 5, kind: input, shape index: {}]   ;;  %s1250_s6 = inlined_call_operand.vmem [shape: f32[64,1], index: 6, kind: input, shape index: {}]   ;;  %s1251_s7 = inlined_call_operand.vmem [shape: bf16[1,64], index: 7, kind: input, shape index: {}]   ;;  %s1252_s8 = inlined_call_operand.<no memory space> [shape: f32[1,1], index: 8, kind: input, shape index: {}]   ;;  %s1253_s9 = inlined_call_operand.hbm [shape: f32[1,128], index: 9, kind: output, shape index: {}]  }
   0x1   :  { %v43_v0 = vld [vmem:[%s1244_s0] sm:$0xff]  ;;  %v44_v1 = vld [vmem:[%s1244_s0 + $0x8] sm:$0xff]  ;;  %v45_v2 = vld [vmem:[%s1244_s0 + $0x10] sm:$0xff]  ;;  %915 = vset.pattern.permute.xlu0 %v949_v6  ;;  %916 = vset.pattern.permute.xlu1 %v949_v6 }
   0x2   :  { %v863_v3 = vpack.c.bf16 %v44_v1, %v43_v0  ;;  %vm1014_vm1 = vmpackc.low %vm107_vm0, %vm107_vm0  ;;  %v46_v5 = vld [vmem:[%s1244_s0 + $0x18] sm:$0xff]  ;;  %v35_v8 = vld [vmem:[%s1245_s1] sm:$0xff] }
   0x3   :  { %v869_v7 = vpack.c.bf16 %v46_v5, %v45_v2  ;;  %v47_v9 = vld [vmem:[%s1244_s0 + $0x20] sm:$0xff]  ;;  %v48_v10 = vld [vmem:[%s1244_s0 + $0x28] sm:$0xff]  ;;  %807 = vmatprep.mubr.msk.f32.mxu0 %vm107_vm0, %v35_v8  ;;  %v61_v12 = vld [vmem:[%s1246_s2 + $0x10] sm:$0xff] }
   0x4   :  { %865 = vmatprep.subr.msk.bf16.mxu0 %vm1014_vm1, %v863_v3  ;;  %v59_v11 = vld [vmem:[%s1246_s2] sm:$0xff]  ;;  %v875_v13 = vpack.c.bf16 %v48_v10, %v47_v9  ;;  %79 = vperm.xlu1 %916, %v61_v12   ;;  %v60_v14 = vld [vmem:[%s1246_s2 + $0x8] sm:$0xff]  ;;  %v62_v15 = vld [vmem:[%s1246_s2 + $0x18] sm:$0xff] }
   0x5   :  { %868 = vmatpush3.bf16.xpose.msk.msra.mxu0 %vm1014_vm1, %v863_v3  ;;  %69 = vperm.xlu0 %915, %v59_v11   ;;  %v49_v16 = vld [vmem:[%s1244_s0 + $0x30] sm:$0xff]  ;;  %v50_v17 = vld [vmem:[%s1244_s0 + $0x38] sm:$0xff]  ;;  %v63_v18 = vld [vmem:[%s1246_s2 + $0x20] sm:$0xff] }
   0x6   :  { %871 = vmatprep.subr.msk.bf16.mxu0 %vm1014_vm1, %v869_v7  ;;  %v64_v19 = vld [vmem:[%s1246_s2 + $0x28] sm:$0xff]  ;;  %v65_v20 = vld [vmem:[%s1246_s2 + $0x30] sm:$0xff]  ;;  %v881_v21 = vpack.c.bf16 %v50_v17, %v49_v16  ;;  %v66_v22 = vld [vmem:[%s1246_s2 + $0x38] sm:$0xff] }
   0x8   :  { %84 = vperm.xlu1 %916, %v62_v15  }
   0x9   :  { %74 = vperm.xlu0 %915, %v60_v14  }
   0xc   :  { %94 = vperm.xlu1 %916, %v64_v19  }
   0xd   :  { %874 = vmatpush3.bf16.xpose.msk.msra.mxu0 %vm1014_vm1, %v869_v7  ;;  %89 = vperm.xlu0 %915, %v63_v18  }
   0xe   :  { %877 = vmatprep.subr.msk.bf16.mxu0 %vm1014_vm1, %v875_v13 }
  0x11   :  { %99 = vperm.xlu0 %915, %v65_v20  }
  0x15   :  { %880 = vmatpush3.bf16.xpose.msk.msra.mxu0 %vm1014_vm1, %v875_v13 }
  0x16   :  { %883 = vmatprep.subr.msk.bf16.mxu0 %vm1014_vm1, %v881_v21 }
  0x17   :  { %15 = vsyncpa [#allocation4], 0  ;;  %v51_v23 = vld [vmem:[%s1244_s0 + $0x40] sm:$0xff]  ;;  %v52_v24 = vld [vmem:[%s1244_s0 + $0x48] sm:$0xff]  ;;  %104 = vperm.xlu1 %916, %v66_v22   ;;  %vm373_vm2 = vcmask 523264   ;;  %vm951_vm3 = vmmov 0  }
  0x18   :  { %v305_v25 = vld [vmem:[%s1248_s4] sm:$0xff]  ;;  %v306_v26 = vld [vmem:[%s1248_s4 + $0x8] sm:$0xff]  ;;  %v887_v27 = vpack.c.bf16 %v52_v24, %v51_v23  ;;  %v307_v28 = vld [vmem:[%s1248_s4 + $0x10] sm:$0xff]  ;;  %s952_s28 = smov [#allocation3]  }
  0x19   :  { %315 = vperm.xlu0 %915, %v305_v25   ;;  %v308_v29 = vld [vmem:[%s1248_s4 + $0x18] sm:$0xff]  ;;  %v53_v30 = vld [vmem:[%s1244_s0 + $0x50] sm:$0xff]  ;;  %v309_v32 = vld [vmem:[%s1248_s4 + $0x20] sm:$0xff] }
  0x1a   :  { %v54_v31 = vld [vmem:[%s1244_s0 + $0x58] sm:$0xff]  ;;  %v310_v33 = vld [vmem:[%s1248_s4 + $0x28] sm:$0xff]  ;;  %v311_v35 = vld [vmem:[%s1248_s4 + $0x30] sm:$0xff] }
  0x1b   :  { %320 = vperm.xlu1 %916, %v306_v26   ;;  %v893_v34 = vpack.c.bf16 %v54_v31, %v53_v30  ;;  %v312_v36 = vld [vmem:[%s1248_s4 + $0x38] sm:$0xff]  ;;  %v55_v37 = vld [vmem:[%s1244_s0 + $0x60] sm:$0xff]  ;;  %v56_v38 = vld [vmem:[%s1244_s0 + $0x68] sm:$0xff]  ;;  %s681_s4 = sshll.u32 %s952_s28, 4  ;;  %s682_s4 = int_to_ptr.vmem [resolvable:$true] %s681_s4 }
  0x1c   :  { %v471_v39 = vld [vmem:[%s1250_s6] sm:$0xff]  ;;  %v472_v40 = vld [vmem:[%s1250_s6 + $0x8] sm:$0xff]  ;;  %v899_v41 = vpack.c.bf16 %v56_v38, %v55_v37  ;;  %v473_v42 = vld [vmem:[%s1250_s6 + $0x10] sm:$0xff]  ;;  %s925_s29 = scalar_lea.vmem %s682_s4, 16  ;;  %s929_s30 = scalar_lea.vmem %s682_s4, 32 }
  0x1d   :  { %886 = vmatpush3.bf16.xpose.msk.msra.mxu0 %vm1014_vm1, %v881_v21  ;;  %325 = vperm.xlu0 %915, %v307_v28   ;;  %v474_v43 = vld [vmem:[%s1250_s6 + $0x18] sm:$0xff]  ;;  %v57_v44 = vld [vmem:[%s1244_s0 + $0x70] sm:$0xff]  ;;  %v475_v46 = vld [vmem:[%s1250_s6 + $0x20] sm:$0xff]  ;;  %p926_p0 = scmp.ne.s32.totalorder %s682_s4, %s925_s29  ;;  %p930_p1 = scmp.lt.s32.totalorder %s682_s4, %s682_s4 }
  0x1e   :  { %889 = vmatprep.subr.msk.bf16.mxu0 %vm1014_vm1, %v887_v27  ;;  %v58_v45 = vld [vmem:[%s1244_s0 + $0x78] sm:$0xff]  ;;  %v476_v47 = vld [vmem:[%s1250_s6 + $0x28] sm:$0xff]  ;;  %v477_v49 = vld [vmem:[%s1250_s6 + $0x30] sm:$0xff]  ;;  %p931_p2 = scmp.lt.s32.totalorder %s929_s30, %s925_s29 }
  0x1f   :  { %330 = vperm.xlu1 %916, %v308_v29   ;;  %v905_v48 = vpack.c.bf16 %v58_v45, %v57_v44  ;;  %v478_v50 = vld [vmem:[%s1250_s6 + $0x38] sm:$0xff]  ;;  %v36_v51 = vld [vmem:[%s1245_s1 + $0x8] sm:$0xff]  ;;  %v37_v52 = vld [vmem:[%s1245_s1 + $0x10] sm:$0xff] }
  0x20   :  { %v38_v53 = vld [vmem:[%s1245_s1 + $0x18] sm:$0xff]  ;;  %v39_v54 = vld [vmem:[%s1245_s1 + $0x20] sm:$0xff]  ;;  %v40_v55 = vld [vmem:[%s1245_s1 + $0x28] sm:$0xff]  ;;  %p932_p3 = por %p931_p2, %p930_p1 }
  0x21   :  { %335 = vperm.xlu0 %915, %v309_v32   ;;  %v41_v56 = vld [vmem:[%s1245_s1 + $0x30] sm:$0xff]  ;;  %v42_v57 = vld [vmem:[%s1245_s1 + $0x38] sm:$0xff]  ;;  %v917_v58 = vld [vmem:[%s1247_s3] sm:$0xff]  }
  0x22   :  { %827 = vmatprep.mubr.msk.bf16.mxu1 %vm373_vm2, %v917_v58  ;;  %v918_v31 = vld [vmem:[%s1247_s3 + $0x8] sm:$0xff]   ;;  %v919_v32 = vld [vmem:[%s1247_s3 + $0x10] sm:$0xff]   ;;  %p933_p4 = pnand %p932_p3, %p926_p0 }
  0x23   :  { %340 = vperm.xlu1 %916, %v310_v33   ;;  %v920_v33 = vld [vmem:[%s1247_s3 + $0x18] sm:$0xff]  }
  0x25   :  { %892 = vmatpush3.bf16.xpose.msk.msra.mxu0 %vm1014_vm1, %v887_v27  ;;  %345 = vperm.xlu0 %915, %v311_v35  }
  0x26   :  { %895 = vmatprep.subr.msk.bf16.mxu0 %vm1014_vm1, %v893_v34 }
  0x27   :  { %350 = vperm.xlu1 %916, %v312_v36  }
  0x29   :  { %481 = vperm.xlu0 %915, %v471_v39  }
  0x2b   :  { %486 = vperm.xlu1 %916, %v472_v40  }
  0x2d   :  { %898 = vmatpush3.bf16.xpose.msk.msra.mxu0 %vm1014_vm1, %v893_v34  ;;  %491 = vperm.xlu0 %915, %v473_v42   ;;  %v921_v34 = vld [vmem:[%s1249_s5] sm:$0xff]  }
  0x2e   :  { %901 = vmatprep.subr.msk.bf16.mxu0 %vm1014_vm1, %v899_v41 }
  0x2f   :  { %496 = vperm.xlu1 %916, %v474_v43  }
  0x31   :  { %501 = vperm.xlu0 %915, %v475_v46  }
  0x33   :  { %506 = vperm.xlu1 %916, %v476_v47  }
  0x35   :  { %904 = vmatpush3.bf16.xpose.msk.msra.mxu0 %vm1014_vm1, %v899_v41  ;;  %511 = vperm.xlu0 %915, %v477_v49  }
  0x36   :  { %907 = vmatprep.subr.msk.bf16.mxu0 %vm1014_vm1, %v905_v48 }
  0x37   :  { %516 = vperm.xlu1 %916, %v478_v50  }
  0x3d   :  { %910 = vmatpush3.bf16.xpose.msk.msra.mxu0 %vm1014_vm1, %v905_v48 }
  0x44   :  { %808 = vmatmul.mubr.msk.f32.vlgmr.msra.gmra.mrb[0].mxu0 %vm107_vm0, %v36_v51 }
  0x45   :  { %810 = vmatprep.mubr.msk.f32.mxu0 %vm107_vm0, %v37_v52 }
  0x48   :  { %811 = vmatmul.mubr.msk.f32.gmra.mrb[2].mxu0 %vm107_vm0, %v38_v53 }
  0x49   :  { %813 = vmatprep.mubr.msk.f32.mxu0 %vm107_vm0, %v39_v54 }
  0x4c   :  { %814 = vmatmul.mubr.msk.f32.gmra.mrb[4].mxu0 %vm107_vm0, %v40_v55 }
  0x4d   :  { %816 = vmatprep.mubr.msk.f32.mxu0 %vm107_vm0, %v41_v56 }
  0x50   :  { %817 = vmatmul.mubr.msk.f32.gmra.mrb[6].mxu0 %vm107_vm0, %v42_v57 }
  0x83   :  { %v80_v60 = vpop.permute.xlu1 %79 }
  0x84   :  { %v70_v59 = vpop.permute.xlu0 %69 }
  0x87   :  { %v85_v62 = vpop.permute.xlu1 %84 }
  0x88   :  { %v75_v61 = vpop.permute.xlu0 %74 }
  0x8b   :  { %v95_v8 = vpop.permute.xlu1 %94 }
  0x8c   :  { %v90_v11 = vpop.permute.xlu0 %89 }
  0x90   :  { %v100_v23 = vpop.permute.xlu0 %99 }
  0x96   :  { %v105_v20 = vpop.permute.xlu1 %104 }
  0x98   :  { %v316_v35 = vpop.permute.xlu0 %315 }
  0x9a   :  { %v321_v36 = vpop.permute.xlu1 %320 }
  0x9c   :  { %v326_v37 = vpop.permute.xlu0 %325 }
  0x9e   :  { %v331_v38 = vpop.permute.xlu1 %330 }
  0xa0   :  { %v336_v42 = vpop.permute.xlu0 %335 }
  0xa2   :  { %v341_v47 = vpop.permute.xlu1 %340 }
  0xa4   :  { %v346_v54 = vpop.permute.xlu0 %345 }
 0x117   :  { %v809_v63 = vpop.f32.mrb[0].mxu0 }
 0x118   :  { %v252_v0 = vadd.f32 %v809_v63, %v75_v61  ;;  %v246_v1 = vpop.f32.mrb[1].mxu0 }
 0x119   :  { %v247_v2 = vadd.f32 %v246_v1, %v70_v59  ;;  %v351_v59 = vpop.permute.xlu1 %350 }
 0x11a   :  { %v286_v3 = vmax.f32 %v252_v0, 0.0 }
 0x11b   :  { %v285_v4 = vmax.f32 %v247_v2, 0.0  ;;  %v812_v5 = vpop.f32.mrb[2].mxu0 }
 0x11c   :  { %v262_v6 = vadd.f32 %v812_v5, %v85_v62  ;;  %v256_v7 = vpop.f32.mrb[3].mxu0 }
 0x11d   :  { %v257_v9 = vadd.f32 %v256_v7, %v80_v60  ;;  %v293_v10 = vpack.c.bf16 %v286_v3, %v285_v4  ;;  %v922_v7 = vld [vmem:[%s1249_s5 + $0x8] sm:$0xff]  }
 0x11e   :  { %v288_v12 = vmax.f32 %v262_v6, 0.0 }
 0x11f   :  { %v287_v13 = vmax.f32 %v257_v9, 0.0  ;;  %v815_v14 = vpop.f32.mrb[4].mxu0  ;;  %819 = vmatprep.subr.bf16.mxu1 %v293_v10  ;;  %v924_v9 = vld [vmem:[%s1249_s5 + $0x18] sm:$0xff]  }
 0x120   :  { %v272_v15 = vadd.f32 %v815_v14, %v95_v8  ;;  %v266_v16 = vpop.f32.mrb[5].mxu0  ;;  %820 = vmatpush3.bf16.msra.mxu1 %v293_v10  ;;  %v923_v8 = vld [vmem:[%s1249_s5 + $0x10] sm:$0xff]   ;;  %v950_v10 = vmov 0.0  }
 0x121   :  { %v294_v17 = vpack.c.bf16 %v288_v12, %v287_v13  ;;  %v267_v18 = vadd.f32 %v266_v16, %v90_v11  ;;  %v482_v11 = vpop.permute.xlu0 %481  ;;  %v487_v12 = vpop.permute.xlu1 %486 }
 0x122   :  { %v290_v19 = vmax.f32 %v272_v15, 0.0 }
 0x123   :  { %v289_v21 = vmax.f32 %v267_v18, 0.0  ;;  %v818_v22 = vpop.f32.mrb[6].mxu0  ;;  %821 = vmatprep.subr.bf16.mxu1 %v294_v17 }
 0x124   :  { %v282_v24 = vadd.f32 %v818_v22, %v105_v20  ;;  %v276_v25 = vpop.f32.mrb[7].mxu0  ;;  %822 = vmatpush3.bf16.msra.mxu1 %v294_v17 }
 0x125   :  { %v295_v26 = vpack.c.bf16 %v290_v19, %v289_v21  ;;  %v277_v27 = vadd.f32 %v276_v25, %v100_v23  ;;  %v492_v13 = vpop.permute.xlu0 %491  ;;  %v497_v14 = vpop.permute.xlu1 %496 }
 0x126   :  { %v292_v28 = vmax.f32 %v282_v24, 0.0 }
 0x127   :  { %v291_v29 = vmax.f32 %v277_v27, 0.0  ;;  %823 = vmatprep.subr.bf16.mxu1 %v295_v26 }
 0x128   :  { %824 = vmatpush3.bf16.msra.mxu1 %v295_v26 }
 0x129   :  { %v296_v30 = vpack.c.bf16 %v292_v28, %v291_v29  ;;  %v502_v18 = vpop.permute.xlu0 %501  ;;  %v507_v23 = vpop.permute.xlu1 %506 }
 0x12b   :  { %825 = vmatprep.subr.bf16.mxu1 %v296_v30 }
 0x12c   :  { %826 = vmatpush3.bf16.msra.mxu1 %v296_v30 }
 0x12d   :  { %v512_v30 = vpop.permute.xlu0 %511 }
 0x12f   :  { %828 = vmatmul.mubr.msk.bf16.vlgmr.msra.gmra.mrb[0].mxu1 %vm373_vm2, %v918_v31 }
 0x130   :  { %831 = vmatprep.mubr.msk.bf16.mxu1 %vm373_vm2, %v919_v32 }
 0x137   :  { %832 = vmatmul.mubr.msk.bf16.gmra.mrb[4].mxu1 %vm373_vm2, %v920_v33 }
 0x138   :  { %843 = vmatprep.mubr.msk.bf16.mxu1 %vm373_vm2, %v921_v34 }
 0x202   :  { %v829_v39 = vpop.f32.mrb[0].mxu1 }
 0x203   :  { %v429_v40 = vadd.f32 %v829_v39, %v326_v37  ;;  %v420_v41 = vpop.f32.mrb[1].mxu1 }
 0x204   :  { %v421_v43 = vadd.f32 %v420_v41, %v316_v35  ;;  %v830_v44 = vpop.f32.mrb[2].mxu1  ;;  %v517_v35 = vpop.permute.xlu1 %516 }
 0x205   :  { %v432_v45 = vadd.f32 %v830_v44, %v331_v38  ;;  %v423_v46 = vpop.f32.mrb[3].mxu1  ;;  %v453_v49 = vmax.f32 %v429_v40, 0.0 }
 0x206   :  { %v424_v48 = vadd.f32 %v423_v46, %v321_v36  ;;  %v451_v51 = vmax.f32 %v421_v43, 0.0 }
 0x207   :  { %v454_v50 = vmax.f32 %v432_v45, 0.0 }
 0x208   :  { %v452_v52 = vmax.f32 %v424_v48, 0.0  ;;  %v630_v48 = vstv %s1252_s8 }
 0x209   :  { %v460_v53 = vpack.c.bf16 %v454_v50, %v453_v49 }
 0x20a   :  { %v459_v55 = vpack.c.bf16 %v452_v52, %v451_v51  ;;  %v833_v56 = vpop.f32.mrb[4].mxu1 }
 0x20b   :  { %v445_v57 = vadd.f32 %v833_v56, %v346_v54  ;;  %v436_v58 = vpop.f32.mrb[5].mxu1 }
 0x20c   :  { %v437_v60 = vadd.f32 %v436_v58, %v336_v42  ;;  %v834_v61 = vpop.f32.mrb[6].mxu1  ;;  %835 = vmatprep.subr.bf16.mxu1 %v459_v55 }
 0x20d   :  { %v448_v62 = vadd.f32 %v834_v61, %v351_v59  ;;  %v439_v63 = vpop.f32.mrb[7].mxu1  ;;  %836 = vmatpush3.bf16.msra.mxu1 %v459_v55  ;;  %v457_v1 = vmax.f32 %v445_v57, 0.0 }
 0x20e   :  { %v440_v0 = vadd.f32 %v439_v63, %v341_v47  ;;  %837 = vmatprep.subr.bf16.mxu1 %v460_v53  ;;  %v455_v3 = vmax.f32 %v437_v60, 0.0  ;;  %v628_v47 = vld [vmem:[%s1251_s7] sm:$0x1] }
 0x20f   :  { %v458_v2 = vmax.f32 %v448_v62, 0.0 }
 0x210   :  { %v456_v4 = vmax.f32 %v440_v0, 0.0 }
 0x211   :  { %v462_v5 = vpack.c.bf16 %v458_v2, %v457_v1  ;;  %838 = vmatpush3.bf16.msra.mxu1 %v460_v53 }
 0x212   :  { %v461_v6 = vpack.c.bf16 %v456_v4, %v455_v3 }
 0x214   :  { %839 = vmatprep.subr.bf16.mxu1 %v461_v6 }
 0x215   :  { %840 = vmatpush3.bf16.msra.mxu1 %v461_v6 }
 0x216   :  { %841 = vmatprep.subr.bf16.mxu1 %v462_v5 }
 0x219   :  { %842 = vmatpush3.bf16.msra.mxu1 %v462_v5 }
 0x21a   :  { %851 = vmatprep.subr.bf16.mxu1 %v950_v10 }
 0x21c   :  { %844 = vmatmul.mubr.msk.bf16.vlgmr.msra.gmra.mrb[8].mxu1 %vm373_vm2, %v922_v7 }
 0x21d   :  { %847 = vmatprep.mubr.msk.bf16.mxu1 %vm373_vm2, %v923_v8 }
 0x224   :  { %848 = vmatmul.mubr.msk.bf16.gmra.mrb[12].mxu1 %vm373_vm2, %v924_v9 }
 0x225   :  { %859 = vmatprep.mubr.msk.bf16.mxu1 %vm951_vm3, %v950_v10 }
 0x2ef   :  { %v845_v15 = vpop.f32.mrb[8].mxu1 }
 0x2f0   :  { %v594_v16 = vadd.f32 %v845_v15, %v492_v13  ;;  %v585_v17 = vpop.f32.mrb[9].mxu1 }
 0x2f1   :  { %v586_v19 = vadd.f32 %v585_v17, %v482_v11  ;;  %v846_v20 = vpop.f32.mrb[10].mxu1 }
 0x2f2   :  { %v597_v21 = vadd.f32 %v846_v20, %v497_v14  ;;  %v588_v22 = vpop.f32.mrb[11].mxu1  ;;  %v618_v25 = vmax.f32 %v594_v16, 0.0 }
 0x2f3   :  { %v589_v24 = vadd.f32 %v588_v22, %v487_v12  ;;  %v616_v27 = vmax.f32 %v586_v19, 0.0 }
 0x2f4   :  { %v619_v26 = vmax.f32 %v597_v21, 0.0 }
 0x2f5   :  { %v617_v28 = vmax.f32 %v589_v24, 0.0 }
 0x2f6   :  { %v625_v29 = vpack.c.bf16 %v619_v26, %v618_v25 }
 0x2f7   :  { %v624_v31 = vpack.c.bf16 %v617_v28, %v616_v27  ;;  %v849_v32 = vpop.f32.mrb[12].mxu1 }
 0x2f8   :  { %v610_v33 = vadd.f32 %v849_v32, %v512_v30  ;;  %v601_v34 = vpop.f32.mrb[13].mxu1 }
 0x2f9   :  { %v602_v36 = vadd.f32 %v601_v34, %v502_v18  ;;  %v850_v37 = vpop.f32.mrb[14].mxu1  ;;  %852 = vmatpush3.bf16.msra.mxu1 %v624_v31 }
 0x2fa   :  { %v613_v38 = vadd.f32 %v850_v37, %v517_v35  ;;  %v604_v39 = vpop.f32.mrb[15].mxu1  ;;  %853 = vmatprep.subr.bf16.mxu1 %v950_v10  ;;  %v622_v41 = vmax.f32 %v610_v33, 0.0 }
 0x2fb   :  { %v605_v40 = vadd.f32 %v604_v39, %v507_v23  ;;  %v620_v43 = vmax.f32 %v602_v36, 0.0 }
 0x2fc   :  { %v623_v42 = vmax.f32 %v613_v38, 0.0 }
 0x2fd   :  { %v621_v44 = vmax.f32 %v605_v40, 0.0  ;;  %854 = vmatpush3.bf16.msra.mxu1 %v625_v29 }
 0x2fe   :  { %v627_v45 = vpack.c.bf16 %v623_v42, %v622_v41  ;;  %855 = vmatprep.subr.bf16.mxu1 %v950_v10 }
 0x2ff   :  { %v626_v46 = vpack.c.bf16 %v621_v44, %v620_v43 }
 0x301   :  { %856 = vmatpush3.bf16.msra.mxu1 %v626_v46 }
 0x302   :  { %857 = vmatprep.subr.bf16.mxu1 %v950_v10 }
 0x305   :  { %858 = vmatpush3.bf16.msra.mxu1 %v627_v45 }
 0x308   :  { %860 = vmatmul.mubr.msk.bf16.vlgmr.msra.gmra.mrb[16].mxu1 %vm373_vm2, %v628_v47 }
 0x3db   :  { %v668_v49 = vpop.f32.mrb[16].mxu1 }
 0x3dc   :  { %v669_v50 = vadd.f32 %v668_v49, %v630_v48  ;;  %v861_v51 = vpop.f32.mrb[17].mxu1 }
 0x3dd   :  { %v671_v52 = vpop.f32.mrb[18].mxu1 }
 0x3de   :  { %674 = vst [vmem:[#allocation3] sm:$0x1] %v669_v50  ;;  %v862_v53 = vpop.f32.mrb[19].mxu1 }
 0x3df   :  { %936 = shalt.err (!%p933_p4)
}
 0x3e0   :  { %s937_s8 = scalar_lea.hbm %s1253_s9, 16 }
 0x3e1   :  { %p938_p5 = scmp.ne.s32.totalorder %s1253_s9, %s937_s8  ;;  %p941_p6 = scmp.lt.u32.totalorder %s937_s8, %s1253_s9 }
 0x3e3   :  { %p943_p7 = pnand %p941_p6, %p938_p5 }
 0x3e5   :  { %946 = shalt.err (!%p943_p7)
}
 0x3e6   :  { %684 = dma.vmem_to_hbm [thread:$0]  %s682_s4, 16, %s1253_s9, [#allocation4]  }
 0x3e7   :  { %947 = dma.done.wait [#allocation4], 16  }
 0x3e8   :  { %948 = vsyncadd [#allocation4], 4294967280 }
 0x3e9   :  { %688 = vsyncpa [#allocation4], 1 }

</bundles_post_ra>
